<compile_context>
chip_gen: v5e
topology: v5e:2x2
jax: 0.10.0
libtpu: 0.0.40
codegen_flags: <defaults>
</compile_context>

<pallas_src>
import jax
import jax.numpy as jnp
from jax.experimental import pallas as pl
from jax.experimental.pallas import tpu as pltpu


def _round_up(a, b):
    return ((a + b - 1) // b) * b


def _regresion_ciclica_kernel(x_ref, w_ref, phase_ref, bias_ref, o_ref):
    # x_ref:     (tm, PD)  packed input tile (P batch rows per 128-lane row)
    # w_ref:     (PD, P)   block-diagonal amplitude matrix (resident)
    # phase_ref: (1,  PD)  tiled phase row (resident)
    # bias_ref:  (1, 1)    fused bias scalar (SMEM)
    # o_ref:     (tm, P)   output tile; column j = packed batch row j
    x = x_ref[...].astype(jnp.float32)
    s = jnp.sin(x + phase_ref[...])                       # EUP, full 128 lanes
    acc = jnp.dot(s, w_ref[...],                          # MXU: mul + segmented reduce
                  preferred_element_type=jnp.float32)
    o_ref[...] = (acc + bias_ref[0, 0]).astype(o_ref.dtype)


def regresion_ciclica(x, w_sin, b_sin, w_cos, b_cos, *, tm=None):
    """x: (N, D).  w_*: (1, D) (PyTorch Linear weight layout).  b_*: (1,)."""
    x = jnp.asarray(x)
    N, D = x.shape

    # ---- weight fusion: amplitude / phase / fused bias (exact up to f32 rounding) ----
    ws = jnp.asarray(w_sin, jnp.float32).reshape(D)
    wc = jnp.asarray(w_cos, jnp.float32).reshape(D)
    amp = jnp.sqrt(ws * ws + wc * wc)
    phase = jnp.arctan2(wc, ws)
    bias = (jnp.asarray(b_sin, jnp.float32).reshape(()) +
            jnp.asarray(b_cos, jnp.float32).reshape(())).reshape(1, 1)

    # ---- lane-dense packing: P batch rows per 128-lane row ----
    P = 128 // D if (0 < D <= 128 and 128 % D == 0) else 1
    PD = P * D

    n_pad = _round_up(N, P)
    if n_pad != N:                              # at most P-1 rows; no-op when aligned
        x = jnp.pad(x, ((0, n_pad - N), (0, 0)))
    Nr = n_pad // P
    xp = x.reshape(Nr, PD)                      # contiguous reshape: free, no HBM copy

    phase_row = jnp.tile(phase, (P,)).reshape(1, PD)
    col_ids = jnp.arange(PD) // D               # lane l feeds output column l // D
    w_mat = jnp.where(col_ids[:, None] == jnp.arange(P)[None, :],
                      jnp.tile(amp, (P,))[:, None], 0.0).astype(jnp.float32)   # (PD, P)

    # ---- tile selection: big tiles (amortize ~0.35us/step), but keep >= ~8
    #      grid steps so the "parallel" batch axis feeds both v7x TensorCores. ----
    if tm is None:
        tm = min(4096, max(8, _round_up(pl.cdiv(Nr, 8), 8)))
    else:
        tm = max(8, (tm // 8) * 8)
    if tm >= Nr:
        tm = Nr                                  # single full-extent block
    grid = (pl.cdiv(Nr, tm),)                    # ragged last block handled by Pallas

    itemsize = int(jnp.dtype(xp.dtype).itemsize)
    out = pl.pallas_call(
        _regresion_ciclica_kernel,
        out_shape=jax.ShapeDtypeStruct((Nr, P), jnp.float32),
        grid_spec=pltpu.PrefetchScalarGridSpec(
            num_scalar_prefetch=0,
            grid=grid,
            in_specs=[
                pl.BlockSpec((tm, PD), lambda i: (i, 0)),            # packed x tile
                pl.BlockSpec((PD, P), lambda i: (0, 0)),             # amp matrix (resident)
                pl.BlockSpec((1, PD), lambda i: (0, 0)),             # phase row (resident)
                pl.BlockSpec(memory_space=pltpu.MemorySpace.SMEM),   # fused bias scalar
            ],
            out_specs=pl.BlockSpec((tm, P), lambda i: (i, 0)),
        ),
        compiler_params=pltpu.CompilerParams(
            dimension_semantics=("parallel",),      # batch axis -> both TCs on v7x
            vmem_limit_bytes=32 * 1024 * 1024,      # headroom for big double-buffered tiles
        ),
        cost_estimate=pl.CostEstimate(
            flops=2 * Nr * PD * P,
            transcendentals=Nr * PD,
            bytes_accessed=Nr * PD * itemsize + Nr * P * 4 + PD * (P + 1) * 4,
        ),
    )(xp, w_mat, phase_row, bias)

    # Unpack (Nr, P) -> (N, 1); packed column j of row r is original row r*P + j.
    return out.reshape(Nr * P, 1)[:N]


if __name__ == "__main__":
    key = jax.random.PRNGKey(0)
    k_x, k_ws, k_bs, k_wc, k_bc, k_x2 = jax.random.split(key, 6)

    D = 32  # input_dim
    bound = 1.0 / (D ** 0.5)  # mimics nn.Linear's U(-1/sqrt(D), 1/sqrt(D)) init range
    w_sin = jax.random.uniform(k_ws, (1, D), jnp.float32, -bound, bound)
    b_sin = jax.random.uniform(k_bs, (1,), jnp.float32, -bound, bound)
    w_cos = jax.random.uniform(k_wc, (1, D), jnp.float32, -bound, bound)
    b_cos = jax.random.uniform(k_bc, (1,), jnp.float32, -bound, bound)

    def ref_fn(xx):
        return jnp.sin(xx) @ w_sin.T + b_sin + jnp.cos(xx) @ w_cos.T + b_cos

    # Small case: batch=8, input_dim=32 (single packed block).
    x_small = jax.random.normal(k_x, (8, D), jnp.float32)
    out_small = jax.block_until_ready(regresion_ciclica(x_small, w_sin, b_sin, w_cos, b_cos))
    assert out_small.shape == (8, 1)
    assert jnp.allclose(out_small, ref_fn(x_small), atol=1e-4, rtol=1e-4), "small case mismatch"

    # Ragged multi-tile case: exercises packing, >1 grid step, and the
    # masked ragged last block (no full jnp.pad of x).
    x_big = jax.random.normal(k_x2, (1000, D), jnp.float32)
    out_big = jax.block_until_ready(regresion_ciclica(x_big, w_sin, b_sin, w_cos, b_cos))
    assert out_big.shape == (1000, 1)
    assert jnp.allclose(out_big, ref_fn(x_big), atol=1e-4, rtol=1e-4), "multi-tile case mismatch"

    print("KERNEL_OK")
</pallas_src>

<mosaic_0001>
module attributes {stable_mosaic.version = 11 : i64} {
  func.func @_regresion_ciclica_kernel(%arg0: i32, %arg1: memref<2x128xf32, #tpu.memory_space<vmem>>, %arg2: memref<128x4xf32, #tpu.memory_space<vmem>>, %arg3: memref<1x128xf32, #tpu.memory_space<vmem>>, %arg4: memref<1x1xf32, #tpu.memory_space<smem>>, %arg5: memref<2x4xf32, #tpu.memory_space<vmem>>) attributes {dimension_semantics = [#tpu.dimension_semantics<parallel>], iteration_bounds = array<i64: 1>, scalar_prefetch = 0 : i64, scratch_operands = 0 : i64, tpu.core_type = #tpu.core_type<tc>, window_params = [{transform_indices = @transform_0, window_bounds = array<i64: 2, 128>}, {pipeline_mode = #tpu.pipeline_mode<synchronous>, transform_indices = @transform_1, window_bounds = array<i64: 128, 4>}, {pipeline_mode = #tpu.pipeline_mode<synchronous>, transform_indices = @transform_2, window_bounds = array<i64: 1, 128>}, {transform_indices = @transform_3, window_bounds = array<i64: 1, 1>}, {transform_indices = @transform_4, window_bounds = array<i64: 2, 4>}]} {
    %c0 = arith.constant 0 : index
    %c0_0 = arith.constant 0 : index
    %0 = vector.load %arg1[%c0, %c0_0] : memref<2x128xf32, #tpu.memory_space<vmem>>, vector<2x128xf32>
    %c0_1 = arith.constant 0 : index
    %c0_2 = arith.constant 0 : index
    %1 = vector.load %arg3[%c0_1, %c0_2] : memref<1x128xf32, #tpu.memory_space<vmem>>, vector<1x128xf32>
    %2 = vector.broadcast %1 : vector<1x128xf32> to vector<2x128xf32>
    %3 = arith.addf %0, %2 : vector<2x128xf32>
    %4 = math.sin %3 : vector<2x128xf32>
    %c0_3 = arith.constant 0 : index
    %c0_4 = arith.constant 0 : index
    %5 = vector.load %arg2[%c0_3, %c0_4] : memref<128x4xf32, #tpu.memory_space<vmem>>, vector<128x4xf32>
    %cst = arith.constant dense<0.000000e+00> : vector<2x4xf32>
    %6 = tpu.matmul %4, %5, %cst {dimension_numbers = #tpu.dot_dimension_numbers<[1], [0], [0], [1], [0, 0, 1, 1], [], []>} : vector<2x128xf32>, vector<128x4xf32>, vector<2x4xf32> -> vector<2x4xf32>
    %c0_5 = arith.constant 0 : index
    %c0_6 = arith.constant 0 : index
    %7 = memref.load %arg4[%c0_5, %c0_6] : memref<1x1xf32, #tpu.memory_space<smem>>
    %8 = vector.broadcast %7 : f32 to vector<2x4xf32>
    %9 = arith.addf %6, %8 : vector<2x4xf32>
    %c0_7 = arith.constant 0 : index
    %c0_8 = arith.constant 0 : index
    %10 = vector.load %arg5[%c0_7, %c0_8] : memref<2x4xf32, #tpu.memory_space<vmem>>, vector<2x4xf32>
    tpu.vector_store %arg5[%c0_7, %c0_8], %9 {strides = array<i32>} : memref<2x4xf32, #tpu.memory_space<vmem>>, vector<2x4xf32>,
    return
  }
  func.func @transform_0(%arg0: i32) -> (i32, i32) {
    %c0_i32 = arith.constant 0 : i32
    %c0_i32_0 = arith.constant 0 : i32
    return %arg0, %c0_i32 : i32, i32
  }
  func.func @transform_1(%arg0: i32) -> (i32, i32) {
    %c0_i32 = arith.constant 0 : i32
    %c0_i32_0 = arith.constant 0 : i32
    %c0_i32_1 = arith.constant 0 : i32
    return %c0_i32, %c0_i32_0 : i32, i32
  }
  func.func @transform_2(%arg0: i32) -> (i32, i32) {
    %c0_i32 = arith.constant 0 : i32
    %c0_i32_0 = arith.constant 0 : i32
    %c0_i32_1 = arith.constant 0 : i32
    return %c0_i32, %c0_i32_0 : i32, i32
  }
  func.func @transform_3(%arg0: i32) -> (i32, i32) {
    %c0_i32 = arith.constant 0 : i32
    %c0_i32_0 = arith.constant 0 : i32
    %c0_i32_1 = arith.constant 0 : i32
    return %c0_i32, %c0_i32_0 : i32, i32
  }
  func.func @transform_4(%arg0: i32) -> (i32, i32) {
    %c0_i32 = arith.constant 0 : i32
    %c0_i32_0 = arith.constant 0 : i32
    return %arg0, %c0_i32 : i32, i32
  }
}

</mosaic_0001>

<bundles_post_ra>
// kernel: tpu_custom_call.1
= control target key start
LH: loop header
LB: loop body
LE: loop exit
PB: predicated region body
PF: predicated region fallthrough
CT: control target
= control target key end

     0   :  { %s413_s0 = inlined_call_operand.vmem [shape: f32[2,128], index: 0, kind: input, shape index: {}]   ;;  %s414_s1 = inlined_call_operand.vmem [shape: f32[128,4], index: 1, kind: input, shape index: {}]   ;;  %s415_s2 = inlined_call_operand.vmem [shape: f32[1,128], index: 2, kind: input, shape index: {}]   ;;  %s416_s3 = inlined_call_operand.<no memory space> [shape: f32[1,1], index: 3, kind: input, shape index: {}]   ;;  %s417_s4 = inlined_call_operand.hbm [shape: f32[2,4], index: 4, kind: output, shape index: {}]  }
   0x1   :  { %v195_v0 = vld [vmem:[%s414_s1 + $0x78] sm:$0xff]  ;;  %v194_v1 = vld [vmem:[%s414_s1 + $0x70] sm:$0xff]  ;;  %v193_v2 = vld [vmem:[%s414_s1 + $0x68] sm:$0xff] }
   0x2   :  { %198 = vmatpush.msra.mxu0 %v195_v0  ;;  %v192_v3 = vld [vmem:[%s414_s1 + $0x60] sm:$0xff]  ;;  %v191_v5 = vld [vmem:[%s414_s1 + $0x58] sm:$0xff] }
   0x3   :  { %v19_v4 = vld [vmem:[%s413_s0] sm:$0x3] }
   0x4   :  { %199 = vmatpush.msra.mxu0 %v194_v1  ;;  %v247_v6 = vld [vmem:[%s415_s2] ss:$0 sm:$0xff] }
   0x6   :  { %200 = vmatpush.msra.mxu0 %v193_v2 }
   0x8   :  { %201 = vmatpush.msra.mxu0 %v192_v3 }
   0x9   :  { %10 = vsyncpa [#allocation4], 0  ;;  %v190_v7 = vld [vmem:[%s414_s1 + $0x50] sm:$0xff]  ;;  %v331_v8 = vadd.f32 %v247_v6, %v19_v4  ;;  %v189_v9 = vld [vmem:[%s414_s1 + $0x48] sm:$0xff]  ;;  %v274_v27 = vmov 683565275  }
   0xa   :  { %202 = vmatpush.msra.mxu0 %v191_v5  ;;  %v188_v11 = vld [vmem:[%s414_s1 + $0x40] sm:$0xff]  ;;  %v187_v14 = vld [vmem:[%s414_s1 + $0x38] sm:$0xff]  ;;  %v186_v16 = vld [vmem:[%s414_s1 + $0x30] sm:$0xff]  ;;  %v275_v29 = vmov 2475754826   ;;  %s281_s24 = smov [#allocation3]  }
   0xb   :  { %v28_v10 = vand.u32 2139095040, %v331_v8  ;;  %v25_v13 = vand.u32 2147483647, %v331_v8  ;;  %v185_v19 = vld [vmem:[%s414_s1 + $0x28] sm:$0xff]  ;;  %v184_v21 = vld [vmem:[%s414_s1 + $0x20] sm:$0xff]  ;;  %v183_v25 = vld [vmem:[%s414_s1 + $0x18] sm:$0xff] }
   0xc   :  { %203 = vmatpush.msra.mxu0 %v190_v7  ;;  %v276_v31 = vmov 2131351028   ;;  %v277_v33 = vmov 2102212464   ;;  %v278_v35 = vmov 920167782  }
   0xd   :  { %v29_v12 = vshrl.u32 %v28_v10, 23  ;;  %v32_v18 = vand.u32 8388607, %v25_v13  ;;  %v182_v37 = vld [vmem:[%s414_s1 + $0x10] sm:$0xff]  ;;  %v279_v42 = vmov 1326507024  }
   0xe   :  { %204 = vmatpush.msra.mxu0 %v189_v9  ;;  %v181_v45 = vld [vmem:[%s414_s1 + $0x8] sm:$0xff]  ;;  %v180_v51 = vld [vmem:[%s414_s1] sm:$0xff]  ;;  %vm27_vm12 = vcmp.lt.s32.totalorder %v331_v8, 0  ;;  %vm26_vm13 = vcmp.le.f32.partialorder %v25_v13, 0.7853982  ;;  %s225_s25 = sshll.u32 %s281_s24, 4  ;;  %s226_s25 = int_to_ptr.vmem [resolvable:$true] %s225_s25 }
   0xf   :  { %v236_v15 = vadd.s32 4294967169, %v29_v12  ;;  %v33_v23 = vor.u32 8388608, %v32_v18  ;;  %s227_s28 = sshll.u32 %s417_s4, 4  ;;  %s228_s28 = int_to_ptr.hbm [resolvable:$true] %s227_s28 }
  0x10   :  { %205 = vmatpush.msra.mxu0 %v188_v11 }
  0x11   :  { %v35_v17 = vadd.s32 1, %v236_v15  ;;  %v364_v44 = vshll.u32 %v33_v23, 8 }
  0x12   :  { %206 = vmatpush.msra.mxu0 %v187_v14 }
  0x13   :  { %vm36_vm0 = vcmp.gt.s32.totalorder %v35_v17, 0  ;;  %v74_v58 = vand.u32 65535, %v364_v44  ;;  %v75_v59 = vshrl.u32 %v364_v44, 16 }
  0x14   :  { %207 = vmatpush.msra.mxu0 %v186_v16  ;;  %v37_v20 = vsel %vm36_vm0, %v35_v17, 0 }
  0x15   :  { %v39_v22 = vand.u32 31, %v37_v20  ;;  %v355_v24 = vshrl.u32 %v37_v20, 5  ;;  %v280_v20 = vmov 0  }
  0x16   :  { %208 = vmatpush.msra.mxu0 %v185_v19 }
  0x17   :  { %v40_v26 = vsub.s32 32, %v39_v22  ;;  %v42_v28 = vshll.u32 %v274_v27, %v39_v22  ;;  %v45_v30 = vshll.u32 %v275_v29, %v39_v22  ;;  %v48_v32 = vshll.u32 %v276_v31, %v39_v22 }
  0x18   :  { %209 = vmatpush.msra.mxu0 %v184_v21  ;;  %v51_v34 = vshll.u32 %v277_v33, %v39_v22  ;;  %v54_v36 = vshll.u32 %v278_v35, %v39_v22  ;;  %vm57_vm1 = vcmp.lt.s32.totalorder %v355_v24, 1  ;;  %vm60_vm2 = vcmp.lt.s32.totalorder %v355_v24, 4 }
  0x19   :  { %v43_v38 = vshrl.u32 %v275_v29, %v40_v26  ;;  %v46_v39 = vshrl.u32 %v276_v31, %v40_v26  ;;  %v49_v40 = vshrl.u32 %v277_v33, %v40_v26  ;;  %v52_v41 = vshrl.u32 %v278_v35, %v40_v26 }
  0x1a   :  { %210 = vmatpush.msra.mxu0 %v183_v25  ;;  %v55_v43 = vshrl.u32 %v279_v42, %v40_v26  ;;  %vm59_vm3 = vcmp.lt.s32.totalorder %v355_v24, 3  ;;  %vm58_vm4 = vcmp.lt.s32.totalorder %v355_v24, 2  ;;  %v41_v2 = vshrl.u32 %v274_v27, %v40_v26 }
  0x1b   :  { %v44_v46 = vor.u32 %v43_v38, %v42_v28  ;;  %v47_v47 = vor.u32 %v46_v39, %v45_v30  ;;  %v50_v48 = vor.u32 %v49_v40, %v48_v32  ;;  %v53_v49 = vor.u32 %v52_v41, %v51_v34 }
  0x1c   :  { %211 = vmatpush.msra.mxu0 %v182_v37  ;;  %v56_v50 = vor.u32 %v55_v43, %v54_v36 }
  0x1d   :  { %v65_v52 = vsel %vm57_vm1, %v44_v46, %v47_v47  ;;  %v69_v53 = vsel %vm57_vm1, %v47_v47, %v50_v48  ;;  %v66_v54 = vsel %vm60_vm2, %v53_v49, 920167782  ;;  %v61_v17 = vsel %vm57_vm1, %v41_v2, %v44_v46 }
  0x1e   :  { %212 = vmatpush.msra.mxu0 %v181_v45  ;;  %v70_v55 = vsel %vm60_vm2, %v56_v50, 1326507024  ;;  %v67_v56 = vsel %vm59_vm3, %v50_v48, %v66_v54  ;;  %v62_v19 = vsel %vm60_vm2, %v50_v48, 2102212464  ;;  %vm168_vm1 = vweird.f32 %v331_v8 }
  0x1f   :  { %v71_v57 = vsel %vm59_vm3, %v53_v49, %v70_v55  ;;  %v68_v60 = vsel %vm58_vm4, %v65_v52, %v67_v56  ;;  %v63_v30 = vsel %vm59_vm3, %v47_v47, %v62_v19  ;;  %vm218_vm2 = vcmask 25600  }
  0x20   :  { %213 = vmatpush.msra.mxu0 %v180_v51  ;;  %v72_v61 = vsel %vm58_vm4, %v69_v53, %v71_v57  ;;  %v98_v0 = vand.u32 65535, %v68_v60  ;;  %v99_v1 = vshrl.u32 %v68_v60, 16  ;;  %v64_v38 = vsel %vm58_vm4, %v61_v17, %v63_v30 }
  0x21   :  { %v76_v62 = vand.u32 65535, %v72_v61  ;;  %v77_v63 = vshrl.u32 %v72_v61, 16  ;;  %v118_v42 = vmul.u32 %v364_v44, %v64_v38 }
  0x22   :  { %v100_v6 = vmul.u32 %v98_v0, %v74_v58  ;;  %v101_v7 = vmul.u32 %v99_v1, %v74_v58  ;;  %v102_v9 = vmul.u32 %v98_v0, %v75_v59  ;;  %v103_v14 = vmul.u32 %v99_v1, %v75_v59 }
  0x23   :  { %v78_v3 = vmul.u32 %v76_v62, %v74_v58  ;;  %v79_v4 = vmul.u32 %v77_v63, %v74_v58  ;;  %v80_v5 = vmul.u32 %v76_v62, %v75_v59  ;;  %v81_v10 = vmul.u32 %v77_v63, %v75_v59 }
  0x24   :  { %v104_v15 = vshll.u32 %v101_v7, 16  ;;  %v106_v16 = vshll.u32 %v102_v9, 16  ;;  %v105_v28 = vshrl.u32 %v101_v7, 16  ;;  %v107_v34 = vshrl.u32 %v102_v9, 16 }
  0x25   :  { %v82_v11 = vshll.u32 %v79_v4, 16  ;;  %v84_v12 = vshll.u32 %v80_v5, 16  ;;  %v83_v23 = vshrl.u32 %v79_v4, 16  ;;  %v85_v31 = vshrl.u32 %v80_v5, 16 }
  0x26   :  { %vm108_vm6 = vc.u32 %v100_v6, %v104_v15  ;;  %v110_v22 = vadd.s32 %v104_v15, %v100_v6 }
  0x27   :  { %vm86_vm5 = vc.u32 %v78_v3, %v82_v11  ;;  %v88_v18 = vadd.s32 %v82_v11, %v78_v3  ;;  %v109_v26 = vsel %vm108_vm6, 1, %v280_v20 }
  0x28   :  { %v87_v21 = vsel %vm86_vm5, 1, %v280_v20  ;;  %v111_v29 = vadd.s32 %v109_v26, %v103_v14  ;;  %vm112_vm8 = vc.u32 %v110_v22, %v106_v16  ;;  %v114_v37 = vadd.s32 %v110_v22, %v106_v16 }
  0x29   :  { %v89_v25 = vadd.s32 %v87_v21, %v81_v10  ;;  %vm90_vm7 = vc.u32 %v88_v18, %v84_v12  ;;  %v113_v33 = vsel %vm112_vm8, 1, %v280_v20 }
  0x2a   :  { %v91_v27 = vsel %vm90_vm7, 1, %v280_v20  ;;  %v115_v35 = vadd.s32 %v113_v33, %v111_v29 }
  0x2b   :  { %v93_v32 = vadd.s32 %v91_v27, %v89_v25 }
  0x2c   :  { %v116_v39 = vadd.s32 %v115_v35, %v105_v28 }
  0x2d   :  { %v94_v36 = vadd.s32 %v93_v32, %v83_v23  ;;  %v197_v32 = vstv %s416_s3 }
  0x2e   :  { %v117_v41 = vadd.s32 %v116_v39, %v107_v34 }
  0x2f   :  { %v95_v40 = vadd.s32 %v94_v36, %v85_v31 }
  0x30   :  { %v121_v43 = vadd.s32 1, %v117_v41 }
  0x31   :  { %vm120_vm9 = vc.u32 %v95_v40, %v114_v37  ;;  %v119_v24 = vadd.s32 %v114_v37, %v95_v40 }
  0x32   :  { %v122_v45 = vsel %vm120_vm9, %v121_v43, %v117_v41 }
  0x33   :  { %v123_v46 = vadd.s32 %v122_v45, %v118_v42 }
  0x35   :  { %v124_v47 = vadd.s32 536870912, %v123_v46 }
  0x37   :  { %v125_v48 = vshrl.u32 %v124_v47, 30 }
  0x39   :  { %v126_v49 = vshll.u32 %v125_v48, 30  ;;  %v149_v2 = vsub.s32 4, %v125_v48 }
  0x3b   :  { %v127_v50 = vsub.s32 %v123_v46, %v126_v49  ;;  %v150_v5 = vsel %vm27_vm12, %v149_v2, %v125_v48 }
  0x3c   :  { %v152_v9 = vsel %vm26_vm13, 0, %v150_v5 }
  0x3d   :  { %vm128_vm10 = vcmp.lt.s32.totalorder %v127_v50, 0  ;;  %v129_v51 = vsub.s32 0, %v127_v50  ;;  %v169_v15 = vadd.s32 3, %v152_v9 }
  0x3f   :  { %v130_v52 = vsel %vm128_vm10, %v129_v51, %v127_v50  ;;  %v170_v20 = vand.u32 3, %v169_v15 }
  0x40   :  { %v131_v53 = vclz %v130_v52 }
  0x41   :  { %vm175_vm14 = vcmp.eq.s32.totalorder %v170_v20, 2  ;;  %vm172_vm15 = vcmp.eq.s32.totalorder %v170_v20, 0  ;;  %vm171_vm0 = vcmp.lt.s32.totalorder %v170_v20, 2 }
  0x42   :  { %v237_v54 = vadd.s32 4294967294, %v131_v53 }
  0x44   :  { %vm238_vm11 = vcmp.lt.s32.totalorder %v237_v54, 0 }
  0x45   :  { %v134_v55 = vsel %vm238_vm11, 0, %v237_v54 }
  0x46   :  { %v135_v56 = vsub.s32 32, %v134_v55  ;;  %v136_v57 = vshll.u32 %v127_v50, %v134_v55  ;;  %v139_v58 = vsub.s32 4294967266, %v134_v55 }
  0x48   :  { %v137_v44 = vshrl.u32 %v119_v24, %v135_v56  ;;  %v140_v59 = vadd.s32 127, %v139_v58 }
  0x4a   :  { %v138_v60 = vor.u32 %v137_v44, %v136_v57  ;;  %v141_v61 = vshll.u32 %v140_v59, 23 }
  0x4c   :  { %v142_v62 = vor.u32 4788187, %v141_v61  ;;  %v145_v63 = vcvt.s32.f32 %v138_v60 }
  0x4e   :  { %v143_v0 = vand.u32 2147483647, %v142_v62 }
  0x50   :  { %v146_v1 = vmul.f32 %v145_v63, %v143_v0 }
  0x52   :  { %v147_v3 = vxor.u32 2147483648, %v146_v1 }
  0x54   :  { %v148_v4 = vsel %vm27_vm12, %v147_v3, %v146_v1 }
  0x55   :  { %v151_v6 = vsel %vm26_vm13, %v331_v8, %v148_v4 }
  0x56   :  { %v153_v7 = vmul.f32 %v151_v6, %v151_v6 }
  0x58   :  { %v154_v10 = vmul.f32 -0.001358992, %v153_v7  ;;  %v161_v11 = vmul.f32 -0.00019511016, %v153_v7 }
  0x5a   :  { %v155_v12 = vadd.f32 0.041655596, %v154_v10  ;;  %v162_v14 = vadd.f32 0.008332121, %v161_v11 }
  0x5c   :  { %v156_v16 = vmul.f32 %v155_v12, %v153_v7  ;;  %v163_v17 = vmul.f32 %v162_v14, %v153_v7 }
  0x5e   :  { %v157_v18 = vadd.f32 -0.4999988, %v156_v16  ;;  %v164_v19 = vadd.f32 -0.16666654, %v163_v17 }
  0x60   :  { %v158_v21 = vmul.f32 %v157_v18, %v153_v7  ;;  %v165_v22 = vmul.f32 %v164_v19, %v153_v7 }
  0x62   :  { %v159_v13 = vadd.f32 1.0, %v158_v21  ;;  %v166_v23 = vadd.f32 1.0, %v165_v22 }
  0x64   :  { %v167_v25 = vmul.f32 %v166_v23, %v151_v6  ;;  %v176_v26 = vxor.u32 2147483648, %v159_v13 }
  0x66   :  { %v173_v27 = vxor.u32 2147483648, %v167_v25  ;;  %v177_v28 = vsel %vm175_vm14, %v176_v26, %v167_v25 }
  0x68   :  { %v174_v29 = vsel %vm172_vm15, %v159_v13, %v173_v27 }
  0x69   :  { %v178_v30 = vsel %vm171_vm0, %v174_v29, %v177_v28 }
  0x6a   :  { %v179_v31 = vsel %vm168_vm1, nan, %v178_v30 }
  0x6b   :  { %214 = vmatmul.f32.vlgmr.msra.gmra.mxu0 %v179_v31 }
  0xe8   :  { %v215_v33 = vpop.f32.mrf.mxu0 }
  0xe9   :  { %v216_v34 = vadd.f32 %v215_v33, %v197_v32 }
  0xeb   :  { %219 = vst.msk [vmem:[#allocation3] sm:$0x3] %vm218_vm2, %v216_v34 }
  0xec   :  { %230 = dma.vmem_to_hbm [thread:$0]  %s226_s25, 32, %s228_s28, [#allocation4]  }
  0xed   :  { %272 = dma.done.wait [#allocation4], 32  }
  0xee   :  { %273 = vsyncadd [#allocation4], 4294967264 }
  0xef   :  { %235 = vsyncpa [#allocation4], 1 }

</bundles_post_ra>
